<compile_context>
chip_gen: v7x
topology: tpu7x:2x2x1
jax: 0.10.0
libtpu: 0.0.40
codegen_flags: <defaults>
</compile_context>

<pallas_src>
import functools

import jax
import jax.numpy as jnp
from jax.experimental import pallas as pl
from jax.experimental.pallas import tpu as pltpu

_LANE = 128
_SUBLANE = 8


def _round_up(x, m):
    return (x + m - 1) // m * m


def _vmem_capacity_bytes():
    """Best-effort per-core VMEM capacity; conservative fallback = v7x 64 MiB."""
    try:
        info = pltpu.get_tpu_info()
        cap = int(getattr(info, "vmem_capacity_bytes", 0) or 0)
        if cap > 0:
            return cap
    except Exception:
        pass
    return 64 * 1024 * 1024


def _focal_kernel(conf_ref, tgt_ref, locp_ref, loct_ref, out_ref, *,
                  n_anchors, tile_a):
    conf = conf_ref[0].astype(jnp.float32)    # [TA, C]   (anchors on sublanes)
    tgt = tgt_ref[0]                          # [TA, 1]   int32
    locp = locp_ref[0].astype(jnp.float32)    # [TA, 4]
    loct = loct_ref[0].astype(jnp.float32)    # [TA, 4]

    ta, c = conf.shape

    # Ragged-tail mask: the last anchor tile of each batch may read past the
    # anchor axis (garbage rows).  Mask with jnp.where (never multiply) so
    # NaN/Inf in the garbage region cannot leak into the sums.
    row = pl.program_id(1) * tile_a + jax.lax.broadcasted_iota(
        jnp.int32, (ta, 1), 0)
    in_range = row < n_anchors
    valid = jnp.logical_and(in_range, tgt > -1)   # anchors included in CE
    pos = jnp.logical_and(in_range, tgt > 0)      # positive anchors

    # Per-anchor cross entropy: logsumexp(conf) - conf[target] (classes=lanes).
    m = jnp.max(conf, axis=-1, keepdims=True)                               # [TA,1]
    lse = m + jnp.log(jnp.sum(jnp.exp(conf - m), axis=-1, keepdims=True))   # [TA,1]
    cls_iota = jax.lax.broadcasted_iota(jnp.int32, (ta, c), 1)              # [TA,C]
    picked = jnp.sum(jnp.where(cls_iota == tgt, conf, 0.0),
                     axis=-1, keepdims=True)                                # [TA,1]
    ce_s = jnp.sum(jnp.where(valid, lse - picked, 0.0))

    # Smooth L1 on positive anchors (PyTorch default beta=1, sum reduction).
    d = locp - loct
    ad = jnp.abs(d)
    sl1 = jnp.where(ad < 1.0, 0.5 * d * d, ad - 0.5)                        # [TA,4]
    loc_s = jnp.sum(jnp.where(pos, sl1, 0.0))
    cnt_s = jnp.sum(jnp.where(pos, 1.0, 0.0))

    # Private, lane-dense (1, 8, 128) partials block for this grid step:
    # sublane 0 = CE sum, 1 = smooth-L1 sum, 2 = #positive anchors.
    sub = jax.lax.broadcasted_iota(jnp.int32, (1, _SUBLANE, _LANE), 1)
    out_ref[...] = jnp.where(sub == 0, ce_s,
                   jnp.where(sub == 1, loc_s,
                   jnp.where(sub == 2, cnt_s, 0.0)))


def _choose_tile_and_vmem(a, b, c, conf_itemsize, loc_itemsize, tile_a):
    """Anchor-tile size + vmem limit sized against this generation's VMEM."""
    vmem_cap = _vmem_capacity_bytes()
    # Double-buffered input budget: <= half of physical VMEM, capped at 48 MiB
    # (v7x: 64 MiB physical -> 32 MiB budget; v5e/v6e: 128 MiB -> 48 MiB).
    tile_budget = min(vmem_cap // 2, 48 * 1024 * 1024)
    # Lane-padded VMEM bytes per anchor row, per single input buffer.
    lanes_c = _round_up(c, _LANE)
    row_bytes = (lanes_c * conf_itemsize          # conf block
                 + _LANE * 4                      # int32 targets
                 + 2 * _LANE * loc_itemsize)      # loc_pred + loc_target
    ta = min(int(tile_a), max(_SUBLANE, tile_budget // (2 * row_bytes)))
    ta = max(_SUBLANE, (ta // _SUBLANE) * _SUBLANE)
    a_pad = _round_up(a, _SUBLANE)
    ta = min(ta, a_pad)
    if b == 1 and a_pad >= 2 * _SUBLANE:
        # Keep at least 2 grid steps so both v7x TensorCores get work.
        ta = min(ta, _round_up(-(-a_pad // 2), _SUBLANE))
    vmem_limit = min(vmem_cap * 3 // 4, 2 * row_bytes * ta + 16 * 1024 * 1024)
    vmem_limit = max(32 * 1024 * 1024, min(vmem_limit, 112 * 1024 * 1024))
    return ta, int(vmem_limit)


@functools.partial(jax.jit, static_argnames=("gamma", "alpha", "tile_a"))
def focal_loss(conf_preds, loc_preds, conf_targets, loc_targets,
               gamma=2.0, alpha=0.25, tile_a=16384):
    b, a, c = conf_preds.shape

    # Native layouts go straight into the kernel (no transpose, no pad).
    # Only the small label array gets a trailing unit axis (+int32 cast) so
    # per-anchor targets broadcast across the class lanes in-kernel.
    tgt3 = conf_targets.astype(jnp.int32)[..., None]            # [B, A, 1]

    ta, vmem_limit = _choose_tile_and_vmem(
        a, b, c, conf_preds.dtype.itemsize, loc_preds.dtype.itemsize, tile_a)
    n_tiles = -(-a // ta)

    kernel = functools.partial(_focal_kernel, n_anchors=a, tile_a=ta)

    partials = pl.pallas_call(
        kernel,
        out_shape=jax.ShapeDtypeStruct((b * n_tiles, _SUBLANE, _LANE),
                                       jnp.float32),
        grid_spec=pltpu.PrefetchScalarGridSpec(
            num_scalar_prefetch=0,
            grid=(b, n_tiles),
            in_specs=[
                pl.BlockSpec((1, ta, c), lambda bi, ti: (bi, ti, 0)),
                pl.BlockSpec((1, ta, 1), lambda bi, ti: (bi, ti, 0)),
                pl.BlockSpec((1, ta, 4), lambda bi, ti: (bi, ti, 0)),
                pl.BlockSpec((1, ta, 4), lambda bi, ti: (bi, ti, 0)),
            ],
            out_specs=pl.BlockSpec((1, _SUBLANE, _LANE),
                                   lambda bi, ti: (bi * n_tiles + ti, 0, 0)),
        ),
        compiler_params=pltpu.CompilerParams(
            dimension_semantics=("parallel", "parallel"),
            vmem_limit_bytes=vmem_limit,
        ),
    )(conf_preds, tgt3, loc_preds, loc_targets)

    # One lane-0 reduction over all per-tile partials.
    sums = jnp.sum(partials[:, :3, 0], axis=0)          # (ce, smooth_l1, n_pos)
    ce_sum, loc_sum, pos_cnt = sums[0], sums[1], sums[2]

    # Scalar epilogue (exactly mirrors the PyTorch forward).
    p_t_log = -ce_sum
    p_t = jnp.exp(p_t_log)
    conf_loss = -alpha * (jnp.power(1.0 - p_t, gamma) * p_t_log)
    n_norm = jnp.maximum(pos_cnt, 1.0)
    return conf_loss / n_norm, loc_sum / n_norm


def _reference(conf_preds, loc_preds, conf_targets, loc_targets,
               gamma=2.0, alpha=0.25):
    """Pure-JAX reference of the PyTorch forward, for sanity checking."""
    b, a, c = conf_preds.shape
    conf = conf_preds.reshape(-1, c).astype(jnp.float32)
    tgt = conf_targets.reshape(-1).astype(jnp.int32)
    valid = tgt > -1
    logp = jax.nn.log_softmax(conf, axis=-1)
    picked = jnp.take_along_axis(logp, jnp.clip(tgt, 0)[:, None], axis=-1)[:, 0]
    ce_sum = jnp.sum(jnp.where(valid, -picked, 0.0))
    p_t_log = -ce_sum
    p_t = jnp.exp(p_t_log)
    conf_loss = -alpha * ((1.0 - p_t) ** gamma * p_t_log)
    pos = tgt > 0
    d = (loc_preds.reshape(-1, 4) - loc_targets.reshape(-1, 4)).astype(jnp.float32)
    ad = jnp.abs(d)
    sl1 = jnp.where(ad < 1.0, 0.5 * d * d, ad - 0.5)
    loc_loss = jnp.sum(sl1 * pos[:, None].astype(jnp.float32))
    n_norm = jnp.maximum(jnp.sum(pos.astype(jnp.float32)), 1.0)
    return conf_loss / n_norm, loc_loss / n_norm


if __name__ == "__main__":
    key = jax.random.PRNGKey(0)
    k1, k2, k3, k4 = jax.random.split(key, 4)

    batch, n_anchors, num_cls = 2, 64, 8
    conf_preds = jax.random.normal(k1, (batch, n_anchors, num_cls), jnp.float32)
    loc_preds = jax.random.normal(k2, (batch, n_anchors, 4), jnp.float32)
    # labels in [-1, num_cls): -1 = ignore, 0 = background, >0 = positive
    conf_targets = jax.random.randint(k3, (batch, n_anchors), -1, num_cls,
                                      dtype=jnp.int32)
    loc_targets = jax.random.normal(k4, (batch, n_anchors, 4), jnp.float32)

    conf_loss, loc_loss = focal_loss(conf_preds, loc_preds,
                                     conf_targets, loc_targets)
    conf_loss, loc_loss = jax.block_until_ready((conf_loss, loc_loss))

    ref_conf, ref_loc = _reference(conf_preds, loc_preds,
                                   conf_targets, loc_targets)
    assert jnp.allclose(conf_loss, ref_conf, rtol=1e-4, atol=1e-5), (conf_loss, ref_conf)
    assert jnp.allclose(loc_loss, ref_loc, rtol=1e-4, atol=1e-5), (loc_loss, ref_loc)

    print("KERNEL_OK")
</pallas_src>

<mosaic_0001>
module attributes {stable_mosaic.version = 11 : i64} {
  func.func @_focal_kernel(%arg0: i32, %arg1: i32, %arg2: memref<1x64x8xf32, #tpu.memory_space<vmem>>, %arg3: memref<1x64x1xi32, #tpu.memory_space<vmem>>, %arg4: memref<1x64x4xf32, #tpu.memory_space<vmem>>, %arg5: memref<1x64x4xf32, #tpu.memory_space<vmem>>, %arg6: memref<1x8x128xf32, #tpu.memory_space<vmem>>) attributes {dimension_semantics = [#tpu.dimension_semantics<parallel>, #tpu.dimension_semantics<parallel>], iteration_bounds = array<i64: 2, 1>, scalar_prefetch = 0 : i64, scratch_operands = 0 : i64, tpu.core_type = #tpu.core_type<tc>, window_params = [{transform_indices = @transform_0, window_bounds = array<i64: 1, 64, 8>}, {transform_indices = @transform_1, window_bounds = array<i64: 1, 64, 1>}, {transform_indices = @transform_2, window_bounds = array<i64: 1, 64, 4>}, {transform_indices = @transform_3, window_bounds = array<i64: 1, 64, 4>}, {transform_indices = @transform_4, window_bounds = array<i64: 1, 8, 128>}]} {
    %c0 = arith.constant 0 : index
    %c0_0 = arith.constant 0 : index
    %c0_1 = arith.constant 0 : index
    %0 = vector.load %arg2[%c0, %c0_0, %c0_1] : memref<1x64x8xf32, #tpu.memory_space<vmem>>, vector<1x64x8xf32>
    %1 = vector.shape_cast %0 : vector<1x64x8xf32> to vector<64x8xf32>
    %c0_2 = arith.constant 0 : index
    %c0_3 = arith.constant 0 : index
    %c0_4 = arith.constant 0 : index
    %2 = vector.load %arg3[%c0_2, %c0_3, %c0_4] : memref<1x64x1xi32, #tpu.memory_space<vmem>>, vector<1x64x1xi32>
    %3 = vector.shape_cast %2 : vector<1x64x1xi32> to vector<64x1xi32>
    %c0_5 = arith.constant 0 : index
    %c0_6 = arith.constant 0 : index
    %c0_7 = arith.constant 0 : index
    %4 = vector.load %arg4[%c0_5, %c0_6, %c0_7] : memref<1x64x4xf32, #tpu.memory_space<vmem>>, vector<1x64x4xf32>
    %5 = vector.shape_cast %4 : vector<1x64x4xf32> to vector<64x4xf32>
    %c0_8 = arith.constant 0 : index
    %c0_9 = arith.constant 0 : index
    %c0_10 = arith.constant 0 : index
    %6 = vector.load %arg5[%c0_8, %c0_9, %c0_10] : memref<1x64x4xf32, #tpu.memory_space<vmem>>, vector<1x64x4xf32>
    %7 = vector.shape_cast %6 : vector<1x64x4xf32> to vector<64x4xf32>
    %c64_i32 = arith.constant 64 : i32
    %8 = arith.muli %arg1, %c64_i32 : i32
    %9 = tpu.iota {dimensions = array<i32: 0>} : vector<64x1xi32>
    %10 = vector.broadcast %8 : i32 to vector<64x1xi32>
    %11 = arith.addi %10, %9 : vector<64x1xi32>
    %c64_i32_11 = arith.constant 64 : i32
    %12 = vector.broadcast %c64_i32_11 : i32 to vector<64x1xi32>
    %13 = arith.cmpi slt, %11, %12 : vector<64x1xi32>
    %c-1_i32 = arith.constant -1 : i32
    %14 = vector.broadcast %c-1_i32 : i32 to vector<64x1xi32>
    %15 = arith.cmpi sgt, %3, %14 : vector<64x1xi32>
    %16 = arith.andi %13, %15 : vector<64x1xi1>
    %c0_i32 = arith.constant 0 : i32
    %17 = vector.broadcast %c0_i32 : i32 to vector<64x1xi32>
    %18 = arith.cmpi sgt, %3, %17 : vector<64x1xi32>
    %19 = arith.andi %13, %18 : vector<64x1xi1>
    %cst = arith.constant dense<0xFF800000> : vector<64xf32>
    %20 = vector.multi_reduction <maximumf>, %1, %cst [1] : vector<64x8xf32> to vector<64xf32>
    %21 = vector.shape_cast %20 : vector<64xf32> to vector<64x1xf32>
    %22 = vector.broadcast %21 : vector<64x1xf32> to vector<64x8xf32>
    %23 = arith.subf %1, %22 : vector<64x8xf32>
    %24 = math.exp %23 : vector<64x8xf32>
    %cst_12 = arith.constant dense<0.000000e+00> : vector<64xf32>
    %25 = vector.multi_reduction <add>, %24, %cst_12 [1] : vector<64x8xf32> to vector<64xf32>
    %26 = vector.shape_cast %25 : vector<64xf32> to vector<64x1xf32>
    %27 = math.log %26 : vector<64x1xf32>
    %28 = arith.addf %21, %27 : vector<64x1xf32>
    %29 = tpu.iota {dimensions = array<i32: 1>} : vector<64x8xi32>
    %30 = vector.broadcast %3 : vector<64x1xi32> to vector<64x8xi32>
    %31 = arith.cmpi eq, %29, %30 : vector<64x8xi32>
    %cst_13 = arith.constant 0.000000e+00 : f32
    %32 = vector.broadcast %cst_13 : f32 to vector<64x8xf32>
    %33 = arith.select %31, %1, %32 : vector<64x8xi1>, vector<64x8xf32>
    %cst_14 = arith.constant dense<0.000000e+00> : vector<64xf32>
    %34 = vector.multi_reduction <add>, %33, %cst_14 [1] : vector<64x8xf32> to vector<64xf32>
    %35 = vector.shape_cast %34 : vector<64xf32> to vector<64x1xf32>
    %36 = arith.subf %28, %35 : vector<64x1xf32>
    %cst_15 = arith.constant 0.000000e+00 : f32
    %37 = vector.broadcast %cst_15 : f32 to vector<64x1xf32>
    %38 = arith.select %16, %36, %37 : vector<64x1xi1>, vector<64x1xf32>
    %39 = vector.shape_cast %38 : vector<64x1xf32> to vector<1x64x1xf32>
    %cst_16 = arith.constant dense<0.000000e+00> : vector<1xf32>
    %40 = vector.multi_reduction <add>, %39, %cst_16 [1, 2] : vector<1x64x1xf32> to vector<1xf32>
    %41 = vector.shape_cast %40 : vector<1xf32> to vector<1x1x1xf32>
    %42 = vector.extract %41[0, 0, 0] : f32 from vector<1x1x1xf32>
    %43 = arith.subf %5, %7 : vector<64x4xf32>
    %44 = math.absf %43 : vector<64x4xf32>
    %cst_17 = arith.constant 1.000000e+00 : f32
    %45 = vector.broadcast %cst_17 : f32 to vector<64x4xf32>
    %46 = arith.cmpf olt, %44, %45 : vector<64x4xf32>
    %cst_18 = arith.constant 5.000000e-01 : f32
    %47 = vector.broadcast %cst_18 : f32 to vector<64x4xf32>
    %48 = arith.mulf %47, %43 : vector<64x4xf32>
    %49 = arith.mulf %48, %43 : vector<64x4xf32>
    %cst_19 = arith.constant 5.000000e-01 : f32
    %50 = vector.broadcast %cst_19 : f32 to vector<64x4xf32>
    %51 = arith.subf %44, %50 : vector<64x4xf32>
    %52 = arith.select %46, %49, %51 : vector<64x4xi1>, vector<64x4xf32>
    %cst_20 = arith.constant 0.000000e+00 : f32
    %53 = vector.shape_cast %19 : vector<64x1xi1> to vector<64x1xi1>
    %54 = vector.broadcast %53 : vector<64x1xi1> to vector<64x4xi1>
    %55 = vector.broadcast %cst_20 : f32 to vector<64x4xf32>
    %56 = arith.select %54, %52, %55 : vector<64x4xi1>, vector<64x4xf32>
    %57 = vector.shape_cast %56 : vector<64x4xf32> to vector<1x64x4xf32>
    %cst_21 = arith.constant dense<0.000000e+00> : vector<1xf32>
    %58 = vector.multi_reduction <add>, %57, %cst_21 [1, 2] : vector<1x64x4xf32> to vector<1xf32>
    %59 = vector.shape_cast %58 : vector<1xf32> to vector<1x1x1xf32>
    %60 = vector.extract %59[0, 0, 0] : f32 from vector<1x1x1xf32>
    %cst_22 = arith.constant 1.000000e+00 : f32
    %cst_23 = arith.constant 0.000000e+00 : f32
    %61 = vector.broadcast %cst_22 : f32 to vector<64x1xf32>
    %62 = vector.broadcast %cst_23 : f32 to vector<64x1xf32>
    %63 = arith.select %19, %61, %62 : vector<64x1xi1>, vector<64x1xf32>
    %64 = vector.shape_cast %63 : vector<64x1xf32> to vector<1x64x1xf32>
    %cst_24 = arith.constant dense<0.000000e+00> : vector<1xf32>
    %65 = vector.multi_reduction <add>, %64, %cst_24 [1, 2] : vector<1x64x1xf32> to vector<1xf32>
    %66 = vector.shape_cast %65 : vector<1xf32> to vector<1x1x1xf32>
    %67 = vector.extract %66[0, 0, 0] : f32 from vector<1x1x1xf32>
    %68 = tpu.iota {dimensions = array<i32: 1>} : vector<1x8x128xi32>
    %c0_i32_25 = arith.constant 0 : i32
    %69 = vector.broadcast %c0_i32_25 : i32 to vector<1x8x128xi32>
    %70 = arith.cmpi eq, %68, %69 : vector<1x8x128xi32>
    %c1_i32 = arith.constant 1 : i32
    %71 = vector.broadcast %c1_i32 : i32 to vector<1x8x128xi32>
    %72 = arith.cmpi eq, %68, %71 : vector<1x8x128xi32>
    %c2_i32 = arith.constant 2 : i32
    %73 = vector.broadcast %c2_i32 : i32 to vector<1x8x128xi32>
    %74 = arith.cmpi eq, %68, %73 : vector<1x8x128xi32>
    %cst_26 = arith.constant 0.000000e+00 : f32
    %75 = vector.broadcast %67 : f32 to vector<1x8x128xf32>
    %76 = vector.broadcast %cst_26 : f32 to vector<1x8x128xf32>
    %77 = arith.select %74, %75, %76 : vector<1x8x128xi1>, vector<1x8x128xf32>
    %78 = vector.broadcast %60 : f32 to vector<1x8x128xf32>
    %79 = arith.select %72, %78, %77 : vector<1x8x128xi1>, vector<1x8x128xf32>
    %80 = vector.broadcast %42 : f32 to vector<1x8x128xf32>
    %81 = arith.select %70, %80, %79 : vector<1x8x128xi1>, vector<1x8x128xf32>
    %c0_27 = arith.constant 0 : index
    %c0_28 = arith.constant 0 : index
    %c0_29 = arith.constant 0 : index
    %82 = vector.load %arg6[%c0_27, %c0_28, %c0_29] : memref<1x8x128xf32, #tpu.memory_space<vmem>>, vector<1x8x128xf32>
    tpu.vector_store %arg6[%c0_27, %c0_28, %c0_29], %81 {strides = array<i32>} : memref<1x8x128xf32, #tpu.memory_space<vmem>>, vector<1x8x128xf32>,
    return
  }
  func.func @transform_0(%arg0: i32, %arg1: i32) -> (i32, i32, i32) {
    %c0_i32 = arith.constant 0 : i32
    %c0_i32_0 = arith.constant 0 : i32
    return %arg0, %arg1, %c0_i32 : i32, i32, i32
  }
  func.func @transform_1(%arg0: i32, %arg1: i32) -> (i32, i32, i32) {
    %c0_i32 = arith.constant 0 : i32
    %c0_i32_0 = arith.constant 0 : i32
    return %arg0, %arg1, %c0_i32 : i32, i32, i32
  }
  func.func @transform_2(%arg0: i32, %arg1: i32) -> (i32, i32, i32) {
    %c0_i32 = arith.constant 0 : i32
    %c0_i32_0 = arith.constant 0 : i32
    return %arg0, %arg1, %c0_i32 : i32, i32, i32
  }
  func.func @transform_3(%arg0: i32, %arg1: i32) -> (i32, i32, i32) {
    %c0_i32 = arith.constant 0 : i32
    %c0_i32_0 = arith.constant 0 : i32
    return %arg0, %arg1, %c0_i32 : i32, i32, i32
  }
  func.func @transform_4(%arg0: i32, %arg1: i32) -> (i32, i32, i32) {
    %c1_i32 = arith.constant 1 : i32
    %0 = arith.muli %arg0, %c1_i32 : i32
    %1 = arith.addi %0, %arg1 : i32
    %c0_i32 = arith.constant 0 : i32
    %c0_i32_0 = arith.constant 0 : i32
    %c0_i32_1 = arith.constant 0 : i32
    return %1, %c0_i32, %c0_i32_0 : i32, i32, i32
  }
}

</mosaic_0001>

<bundles_post_ra>
// kernel: focal_loss.1
= control target key start
LH: loop header
LB: loop body
LE: loop exit
PB: predicated region body
PF: predicated region fallthrough
CT: control target
= control target key end

     0   :  { %s1073_s15 = smov 0   ;;  %s1075_s16 = smov 0   ;;  %s1485_s0 = inlined_call_operand.vmem [shape: f32[2,64,8], index: 0, kind: input, shape index: {}]   ;;  %s1486_s1 = inlined_call_operand.vmem [shape: s32[2,64,1], index: 1, kind: input, shape index: {}]   ;;  %s1487_s2 = inlined_call_operand.vmem [shape: f32[2,64,4], index: 2, kind: input, shape index: {}]   ;;  %s1488_s3 = inlined_call_operand.vmem [shape: f32[2,64,4], index: 3, kind: input, shape index: {}]   ;;  %s1489_s4 = inlined_call_operand.vmem [shape: f32[2,8,128], index: 4, kind: output, shape index: {}]  }
   0x1   :  { %s1077_s17 = smov 0  }
   0x2 LB: > { %s26_s18 = sadd.s32 1, %s1040_s16  ;;  %p932_p0 = scmp.ge.s32.totalorder %s1044_s17, 1  ;;  %s1044_s17 = sphi %s1077_s17, %s14_s17   ;;  %s1040_s16 = sphi %s1075_s16, %s1507_s16   ;;  %s1036_s15 = sphi %s1073_s15, %s1506_s15  }
   0x3   : > { %p28_p1 = scmp.ge.s32.totalorder %s26_s18, 2  ;;  %p234_p2 = scmp.lt.s32.totalorder %s1044_s17, 3 }
   0x5   : > { %s1509_s18 = smov (%p28_p1, %s26_s18), 0  ;;  %p235_p3 = pnand %p932_p0, %p234_p2 }
   0x6   : > { %p292_p4 = scmp.lt.s32.totalorder (!%p235_p3), %s1036_s15, 1  ;;  %v1046_v0 = vmov (!%p235_p3), 0   ;;  %vm428_vm0 = vcmask (!%p235_p3), 64512   ;;  %vm607_vm2 = vcmask (!%p235_p3), 7168   ;;  %v1047_v13 = vmov (!%p235_p3), 0.0  }
   0x7   : > { %238 = sbr.rel (%p235_p3) target bundleno = 598 (0x256), region = 36  ;;  %989 = vset.pattern.permute.xlu1 (!%p235_p3), %v1046_v0  ;;  %988 = vset.pattern.permute.xlu0 (!%p235_p3), %v1046_v0  ;;  %v370_v48 = vlaneseq (!%p235_p3) }
   0x9   : > { %v1220_v50 = vand.u32 (!%p235_p3), 127, %v370_v48 }
   0xe   : > { %s1511_s15 = smov (!%p292_p4, %s1036_s15), 1 }
   0xf   : > { %s1096_s19 = sshll.u32 %s1511_s15, 6  ;;  %s941_s8 = sshll.u32 %s1511_s15, 3 }
  0x10   : > { %s299_s22 = scalar_lea.vmem %s1485_s0, %s1096_s19  ;;  %s1118_s25 = scalar_lea.vmem %s1486_s1, %s1096_s19 }
  0x11   : > { %v1102_v1 = vld [vmem:[%s299_s22 + $0x10] sm:$0xff]  ;;  %v1104_v2 = vld [vmem:[%s299_s22] sm:$0xff]  ;;  %v1106_v3 = vld [vmem:[%s299_s22 + $0x18] sm:$0xff]  ;;  %s1304_s28 = scalar_lea.vmem %s1487_s2, %s1096_s19  ;;  %s1310_s5 = scalar_lea.vmem %s1488_s3, %s1096_s19 }
  0x12   : > { %v435_v4 = vsel %vm428_vm0, %v1102_v1, -inf  ;;  %v429_v5 = vsel %vm428_vm0, %v1104_v2, -inf  ;;  %v1112_v6 = vld [vmem:[%s299_s22 + $0x8] sm:$0xff]  ;;  %v438_v7 = vsel %vm428_vm0, %v1106_v3, -inf  ;;  %v1125_v9 = vld [vmem:[%s1118_s25] sm:$0xff]  ;;  %v1147_v19 = vld [vmem:[%s299_s22 + $0x38] sm:$0xff]  ;;  %s335_s12 = scalar_lea.vmem %s1489_s4, %s941_s8 }
  0x13   : > { %436 = vmax.xlane.f32.xlu1 %v435_v4  ;;  %430 = vmax.xlane.f32.xlu0 %v429_v5  ;;  %v432_v8 = vsel %vm428_vm0, %v1112_v6, -inf  ;;  %v1127_v10 = vld [vmem:[%s299_s22 + $0x28] sm:$0xff]  ;;  %v1129_v11 = vld [vmem:[%s299_s22 + $0x20] sm:$0xff]  ;;  %vm412_vm1 = vcmp.gt.s32.totalorder %v1125_v9, 0  ;;  %v1149_v20 = vld [vmem:[%s299_s22 + $0x30] sm:$0xff]  ;;  %v450_v23 = vsel %vm428_vm0, %v1147_v19, -inf }
  0x14   : > { %v1133_v12 = vld [vmem:[%s1118_s25 + $0x8] sm:$0xff]  ;;  %v761_v14 = vsel %vm412_vm1, 1.0, %v1047_v13  ;;  %v444_v16 = vsel %vm428_vm0, %v1127_v10, -inf  ;;  %v441_v17 = vsel %vm428_vm0, %v1129_v11, -inf  ;;  %v447_v24 = vsel %vm428_vm0, %v1149_v20, -inf  ;;  %v1158_v25 = vld [vmem:[%s1118_s25 + $0x10] sm:$0xff] }
  0x15   : > { %v769_v15 = vsel %vm607_vm2, %v761_v14, 0.0  ;;  %vm413_vm3 = vcmp.gt.s32.totalorder %v1133_v12, 0  ;;  %v1163_v26 = vld [vmem:[%s1118_s25 + $0x18] sm:$0xff]  ;;  %v688_v27 = vsel %vm412_vm1, 1, %v1046_v0  ;;  %v1170_v28 = vld [vmem:[%s1118_s25 + $0x20] sm:$0xff]  ;;  %v1174_v29 = vld [vmem:[%s1118_s25 + $0x28] sm:$0xff] }
  0x16   : > { %v762_v18 = vsel %vm413_vm3, 1.0, %v1047_v13  ;;  %v1178_v30 = vld [vmem:[%s1118_s25 + $0x30] sm:$0xff]  ;;  %v1182_v31 = vld [vmem:[%s1118_s25 + $0x38] sm:$0xff]  ;;  %v689_v32 = vsel %vm413_vm3, 1, %v1046_v0  ;;  %vm415_vm4 = vcmp.gt.s32.totalorder %v1163_v26, 0  ;;  %vm414_vm5 = vcmp.gt.s32.totalorder %v1158_v25, 0 }
  0x17   : > { %439 = vmax.xlane.f32.xlu1 %v438_v7  ;;  %433 = vmax.xlane.f32.xlu0 %v432_v8  ;;  %v770_v21 = vsel %vm607_vm2, %v762_v18, 0.0  ;;  %v764_v33 = vsel %vm415_vm4, 1.0, %v1047_v13  ;;  %v763_v34 = vsel %vm414_vm5, 1.0, %v1047_v13  ;;  %vm416_vm6 = vcmp.gt.s32.totalorder %v1170_v28, 0 }
  0x18   : > { %v771_v22 = vadd.f32 %v770_v21, %v769_v15  ;;  %v774_v35 = vsel %vm607_vm2, %v764_v33, 0.0  ;;  %v772_v36 = vsel %vm607_vm2, %v763_v34, 0.0  ;;  %v765_v38 = vsel %vm416_vm6, 1.0, %v1047_v13 }
  0x19   : > { %v776_v39 = vsel %vm607_vm2, %v765_v38, 0.0  ;;  %vm417_vm15 = vcmp.gt.s32.totalorder %v1174_v29, 0  ;;  %vm418_vm1 = vcmp.gt.s32.totalorder %v1178_v30, 0 }
  0x1a   : > { %v773_v37 = vadd.f32 %v772_v36, %v771_v22 }
  0x1b   : > { %445 = vmax.xlane.f32.xlu1 %v444_v16  ;;  %442 = vmax.xlane.f32.xlu0 %v441_v17 }
  0x1c   : > { %v775_v40 = vadd.f32 %v774_v35, %v773_v37 }
  0x1e   : > { %v1203_v41 = vadd.f32 %v776_v39, %v775_v40 }
  0x1f   : > { %451 = vmax.xlane.f32.xlu1 %v450_v23  ;;  %448 = vmax.xlane.f32.xlu0 %v447_v24 }
  0x30   : > { %531 = vperm.xlu1 %989, %v1133_v12  }
  0x34   : > { %534 = vperm.xlu1 %989, %v1158_v25  }
  0x35   : > { %528 = vperm.xlu0 %988, %v1125_v9  }
  0x38   : > { %537 = vperm.xlu1 %989, %v1163_v26  }
  0x39   : > { %697 = vperm.xlu0 %988, %v688_v27  }
  0x3c   : > { %540 = vperm.xlu1 %989, %v1170_v28  }
  0x40   : > { %543 = vperm.xlu1 %989, %v1174_v29  }
  0x44   : > { %546 = vperm.xlu1 %989, %v1178_v30  }
  0x48   : > { %549 = vperm.xlu1 %989, %v1182_v31  }
  0x4c   : > { %700 = vperm.xlu1 %989, %v689_v32  }
  0xa0   : > { %v1205_v42 = vpop.xlane.xlu1 %436  ;;  %v1207_v43 = vpop.xlane.xlu0 %430 }
  0xa1   : > { %v453_v57 = vsub.f32 %v1104_v2, %v1207_v43  ;;  %v455_v14 = vsub.f32 %v1102_v1, %v1205_v42 }
  0xa3   : > { %v461_v63 = vmul.f32 1.442695, %v453_v57  ;;  %v465_v21 = vmul.f32 1.442695, %v455_v14 }
  0xa4   : > { %v1209_v44 = vpop.xlane.xlu1 %439  ;;  %v1211_v45 = vpop.xlane.xlu0 %433 }
  0xa5   : > { %v456_v62 = vsub.f32 %v1106_v3, %v1209_v44  ;;  %v454_v4 = vsub.f32 %v1112_v6, %v1211_v45  ;;  %990 = vpow2.f32 %v461_v63 }
  0xa7   : > { %v467_v15 = vmul.f32 1.442695, %v456_v62 }
  0xa8   : > { %v1213_v46 = vpop.xlane.xlu1 %445  ;;  %v1215_v47 = vpop.xlane.xlu0 %442 }
  0xa9   : > { %v458_v16 = vsub.f32 %v1127_v10, %v1213_v46  ;;  %992 = vpow2.f32 %v467_v15  ;;  %v457_v22 = vsub.f32 %v1129_v11, %v1215_v47  ;;  %v766_v15 = vsel %vm417_vm15, 1.0, %v1047_v13 }
  0xab   : > { %v469_v33 = vmul.f32 1.442695, %v457_v22 }
  0xac   : > { %v1217_v49 = vpop.xlane.xlu1 %451  ;;  %v1222_v51 = vpop.xlane.xlu0 %448 }
  0xad   : > { %v460_v23 = vsub.f32 %v1147_v19, %v1217_v49 }
  0xaf   : > { %v475_v34 = vmul.f32 1.442695, %v460_v23  ;;  %v991_v37 = vpop.eup %990 }
  0xb0   : > { %v532_v52 = vpop.permute.xlu1 %531 }
  0xb1   : > { %vm552_vm7 = vcmp.eq.s32.totalorder %v1220_v50, %v532_v52  ;;  %v477_v52 = vsel %vm428_vm0, %v991_v37, 0.0 }
  0xb2   : > { %v560_v53 = vsel %vm552_vm7, %v1112_v6, 0.0  ;;  %v463_v6 = vmul.f32 1.442695, %v454_v4  ;;  %v691_v4 = vsel %vm415_vm4, 1, %v1046_v0  ;;  %vm736_vm7 = vcmask 31744  }
  0xb3   : > { %v570_v54 = vsel %vm428_vm0, %v560_v53, 0.0  ;;  %v993_v40 = vpop.eup %992 }
  0xb4   : > { %v535_v55 = vpop.permute.xlu1 %534  ;;  %571 = vadd.xlane.f32.xlu1 %v570_v54  ;;  %v529_v56 = vpop.permute.xlu0 %528  ;;  %994 = vpow2.f32 %v463_v6  ;;  %v767_v6 = vsel %vm418_vm1, 1.0, %v1047_v13 }
  0xb5   : > { %vm553_vm8 = vcmp.eq.s32.totalorder %v1220_v50, %v535_v55  ;;  %vm551_vm9 = vcmp.eq.s32.totalorder %v1220_v50, %v529_v56  ;;  %996 = vpow2.f32 %v465_v21  ;;  %v486_v55 = vsel %vm428_vm0, %v993_v40, 0.0 }
  0xb6   : > { %v559_v58 = vsel %vm551_vm9, %v1104_v2, 0.0  ;;  %v561_v61 = vsel %vm553_vm8, %v1102_v1, 0.0  ;;  %v471_v1 = vmul.f32 1.442695, %v458_v16  ;;  %v778_v16 = vsel %vm607_vm2, %v766_v15, 0.0  ;;  %v363_v15 = vld [vmem:[%s1310_s5 + $0x10] sm:$0xff] }
  0xb7   : > { %v567_v59 = vsel %vm428_vm0, %v559_v58, 0.0  ;;  %v573_v2 = vsel %vm428_vm0, %v561_v61, 0.0  ;;  %vm396_vm8 = vcmp.gt.s32.totalorder %v1125_v9, 4294967295  ;;  %vm397_vm9 = vcmp.gt.s32.totalorder %v1133_v12, 4294967295 }
  0xb8   : > { %v538_v60 = vpop.permute.xlu1 %537  ;;  %568 = vadd.xlane.f32.xlu0 %v567_v59  ;;  %998 = vpow2.f32 %v471_v1  ;;  %v698_v21 = vpop.permute.xlu0 %697 }
  0xb9   : > { %vm554_vm10 = vcmp.eq.s32.totalorder %v1220_v50, %v538_v60  ;;  %1000 = vpow2.f32 %v469_v33 }
  0xba   : > { %v562_v5 = vsel %vm554_vm10, %v1106_v3, 0.0  ;;  %1002 = vpow2.f32 %v475_v34 }
  0xbb   : > { %v576_v7 = vsel %vm428_vm0, %v562_v5, 0.0  ;;  %v693_v5 = vsel %vm417_vm15, 1, %v1046_v0  ;;  %vm398_vm15 = vcmp.gt.s32.totalorder %v1158_v25, 4294967295 }
  0xbc   : > { %v541_v8 = vpop.permute.xlu1 %540  ;;  %577 = vadd.xlane.f32.xlu1 %v576_v7  ;;  %574 = vadd.xlane.f32.xlu0 %v573_v2  ;;  %v694_v7 = vsel %vm418_vm1, 1, %v1046_v0  ;;  %v690_v2 = vsel %vm414_vm5, 1, %v1046_v0 }
  0xbd   : > { %vm555_vm11 = vcmp.eq.s32.totalorder %v1220_v50, %v541_v8  ;;  %v692_v8 = vsel %vm416_vm6, 1, %v1046_v0  ;;  %vm720_vm6 = vcmp.eq.s32.totalorder %v698_v21, 1 }
  0xbe   : > { %v563_v3 = vsel %vm555_vm11, %v1129_v11, 0.0  ;;  %v459_v11 = vsub.f32 %v1149_v20, %v1222_v51  ;;  %v995_v54 = vpop.eup %994  ;;  %vm399_vm11 = vcmp.gt.s32.totalorder %v1163_v26, 4294967295 }
  0xbf   : > { %v579_v17 = vsel %vm428_vm0, %v563_v3, 0.0  ;;  %v480_v56 = vsel %vm428_vm0, %v995_v54, 0.0  ;;  %v779_v3 = vadd.f32 %v778_v16, %v1203_v41  ;;  %v362_v41 = vld [vmem:[%s1310_s5 + $0x8] sm:$0xff] }
  0xc0   : > { %v544_v18 = vpop.permute.xlu1 %543  ;;  %580 = vadd.xlane.f32.xlu0 %v579_v17  ;;  %v780_v17 = vsel %vm607_vm2, %v767_v6, 0.0  ;;  %v357_v6 = vld [vmem:[%s1304_s28 + $0x20] sm:$0xff] }
  0xc1   : > { %vm556_vm12 = vcmp.eq.s32.totalorder %v1220_v50, %v544_v18  ;;  %v1294_v18 = vadd.f32 %v780_v17, %v779_v3  ;;  %v365_v3 = vld [vmem:[%s1310_s5 + $0x20] sm:$0xff] }
  0xc2   : > { %v564_v24 = vsel %vm556_vm12, %v1127_v10, 0.0  ;;  %v473_v10 = vmul.f32 1.442695, %v459_v11 }
  0xc3   : > { %v582_v27 = vsel %vm428_vm0, %v564_v24, 0.0  ;;  %v353_v24 = vld [vmem:[%s1304_s28] sm:$0xff] }
  0xc4   : > { %v547_v32 = vpop.permute.xlu1 %546  ;;  %583 = vadd.xlane.f32.xlu1 %v582_v27  ;;  %1004 = vpow2.f32 %v473_v10  ;;  %v361_v27 = vld [vmem:[%s1310_s5] sm:$0xff] }
  0xc5   : > { %vm557_vm13 = vcmp.eq.s32.totalorder %v1220_v50, %v547_v32  ;;  %v632_v11 = vsub.f32 %v353_v24, %v361_v27 }
  0xc6   : > { %v565_v35 = vsel %vm557_vm13, %v1149_v20, 0.0  ;;  %v997_v20 = vpop.eup %996 }
  0xc7   : > { %v585_v36 = vsel %vm428_vm0, %v565_v35, 0.0  ;;  %v999_v57 = vpop.eup %998  ;;  %v483_v58 = vsel %vm428_vm0, %v997_v20, 0.0  ;;  %v656_v10 = vmul.f32 0.5, %v632_v11 }
  0xc8   : > { %v550_v38 = vpop.permute.xlu1 %549  ;;  %586 = vadd.xlane.f32.xlu1 %v585_v36 }
  0xc9   : > { %vm558_vm14 = vcmp.eq.s32.totalorder %v1220_v50, %v550_v38  ;;  %v1001_v50 = vpop.eup %1000  ;;  %v640_v38 = vand.u32 2147483647, %v632_v11  ;;  %v664_v20 = vmul.f32 %v656_v10, %v632_v11  ;;  %v636_v11 = vsub.f32 %v357_v6, %v365_v3 }
  0xca   : > { %v566_v39 = vsel %vm558_vm14, %v1147_v19, 0.0  ;;  %v492_v19 = vsel %vm428_vm0, %v999_v57, 0.0  ;;  %v1003_v59 = vpop.eup %1002  ;;  %v489_v61 = vsel %vm428_vm0, %v1001_v50, 0.0 }
  0xcb   : > { %v588_v53 = vsel %vm428_vm0, %v566_v39, 0.0  ;;  %v498_v60 = vsel %vm428_vm0, %v1003_v59, 0.0  ;;  %vm1330_vm4 = vcmp.lt.f32.partialorder %v640_v38, 1.0 }
  0xcc   : > { %478 = vadd.xlane.f32.xlu1 %v477_v52  ;;  %589 = vadd.xlane.f32.xlu0 %v588_v53  ;;  %v701_v22 = vpop.permute.xlu1 %700 }
  0xcd   : > { %vm721_vm5 = vcmp.eq.s32.totalorder %v701_v22, 1 }
  0xce   : > { %v1005_v62 = vpop.eup %1004 }
  0xcf   : > { %v495_v63 = vsel %vm428_vm0, %v1005_v62, 0.0  ;;  %vm419_vm0 = vcmp.gt.s32.totalorder %v1182_v31, 0 }
  0xd0   : > { %487 = vadd.xlane.f32.xlu1 %v486_v55  ;;  %481 = vadd.xlane.f32.xlu0 %v480_v56  ;;  %v695_v14 = vsel %vm419_vm0, 1, %v1046_v0  ;;  %v354_v0 = vld [vmem:[%s1304_s28 + $0x8] sm:$0xff]  ;;  %v942_v55 = vadd.f32 -0.5, %v640_v38 }
  0xd1   : > { %v633_v33 = vsub.f32 %v354_v0, %v362_v41 }
  0xd2   : > { %v680_v62 = vsel %vm1330_vm4, %v664_v20, %v942_v55 }
  0xd3   : > { %v641_v36 = vand.u32 2147483647, %v633_v33  ;;  %v657_v37 = vmul.f32 0.5, %v633_v33  ;;  %v728_v17 = vsel %vm720_vm6, %v680_v62, 0.0  ;;  %vm402_vm6 = vcmp.gt.s32.totalorder %v1178_v30, 4294967295 }
  0xd4   : > { %493 = vadd.xlane.f32.xlu1 %v492_v19  ;;  %484 = vadd.xlane.f32.xlu0 %v483_v58  ;;  %v356_v19 = vld [vmem:[%s1304_s28 + $0x18] sm:$0xff] }
  0xd5   : > { %v665_v52 = vmul.f32 %v657_v37, %v633_v33  ;;  %v943_v53 = vadd.f32 -0.5, %v641_v36  ;;  %vm1326_vm3 = vcmp.lt.f32.partialorder %v641_v36, 1.0  ;;  %v364_v58 = vld [vmem:[%s1310_s5 + $0x18] sm:$0xff]  ;;  %v737_v36 = vsel %vm736_vm7, %v728_v17, 0.0 }
  0xd7   : > { %v681_v59 = vsel %vm1326_vm3, %v665_v52, %v943_v53  ;;  %vm401_vm3 = vcmp.gt.s32.totalorder %v1174_v29, 4294967295  ;;  %v768_v29 = vsel %vm419_vm0, 1.0, %v1047_v13 }
  0xd8   : > { %499 = vadd.xlane.f32.xlu1 %v498_v60  ;;  %490 = vadd.xlane.f32.xlu0 %v489_v61  ;;  %v358_v60 = vld [vmem:[%s1304_s28 + $0x28] sm:$0xff]  ;;  %v782_v30 = vsel %vm607_vm2, %v768_v29, 0.0 }
  0xd9   : > { %v366_v61 = vld [vmem:[%s1310_s5 + $0x28] sm:$0xff] }
  0xda   : > { %v637_v16 = vsub.f32 %v358_v60, %v366_v61 }
  0xdc   : > { %496 = vadd.xlane.f32.xlu0 %v495_v63  ;;  %v635_v63 = vsub.f32 %v356_v19, %v364_v58  ;;  %v645_v37 = vand.u32 2147483647, %v637_v16  ;;  %v661_v38 = vmul.f32 0.5, %v637_v16  ;;  %v368_v19 = vld [vmem:[%s1310_s5 + $0x38] sm:$0xff] }
  0xde   : > { %v643_v41 = vand.u32 2147483647, %v635_v63  ;;  %v659_v21 = vmul.f32 0.5, %v635_v63  ;;  %vm1368_vm12 = vcmp.lt.f32.partialorder %v645_v37, 1.0 }
  0xe0   : > { %v667_v54 = vmul.f32 %v659_v21, %v635_v63  ;;  %v945_v20 = vadd.f32 -0.5, %v643_v41  ;;  %vm1358_vm10 = vcmp.lt.f32.partialorder %v643_v41, 1.0  ;;  %v1363_v63 = vmul.f32 %v661_v38, %v637_v16 }
  0xe9   : > { %706 = vperm.xlu1 %989, %v691_v4   ;;  %v359_v4 = vld [vmem:[%s1304_s28 + $0x30] sm:$0xff] }
  0xed   : > { %712 = vperm.xlu1 %989, %v693_v5   ;;  %v367_v5 = vld [vmem:[%s1310_s5 + $0x30] sm:$0xff] }
  0xee   : > { %v638_v22 = vsub.f32 %v359_v4, %v367_v5  ;;  %v660_v4 = vmul.f32 0.5, %v636_v11  ;;  %v1365_v5 = vadd.f32 -0.5, %v645_v37 }
  0xf0   : > { %v646_v52 = vand.u32 2147483647, %v638_v22  ;;  %v662_v55 = vmul.f32 0.5, %v638_v22 }
  0xf1   : > { %715 = vperm.xlu1 %989, %v694_v7   ;;  %v729_v7 = vsel %vm721_vm5, %v681_v59, 0.0  ;;  %vm400_vm5 = vcmp.gt.s32.totalorder %v1170_v28, 4294967295 }
  0xf2   : > { %703 = vperm.xlu0 %988, %v690_v2   ;;  %v738_v0 = vsel %vm736_vm7, %v729_v7, 0.0  ;;  %v644_v7 = vand.u32 2147483647, %v636_v11  ;;  %vm1372_vm13 = vcmp.lt.f32.partialorder %v646_v52, 1.0  ;;  %v1376_v3 = vmul.f32 %v662_v55, %v638_v22 }
  0xf3   : > { %v1353_v10 = vadd.f32 %v738_v0, %v737_v36  ;;  %v1378_v16 = vadd.f32 -0.5, %v646_v52  ;;  %v1385_v36 = vmul.f32 %v660_v4, %v636_v11 }
  0xf4   : > { %v1388_v38 = vadd.f32 -0.5, %v644_v7  ;;  %vm1391_vm1 = vcmp.lt.f32.partialorder %v644_v7, 1.0 }
  0xf6   : > { %709 = vperm.xlu0 %988, %v692_v8  }
  0xfa   : > { %718 = vperm.xlu0 %988, %v695_v14   ;;  %v355_v14 = vld [vmem:[%s1304_s28 + $0x10] sm:$0xff] }
  0xfb   : > { %v634_v24 = vsub.f32 %v355_v14, %v363_v15 }
  0xfd   : > { %v642_v56 = vand.u32 2147483647, %v634_v24  ;;  %v658_v62 = vmul.f32 0.5, %v634_v24 }
  0xff   : > { %vm1380_vm14 = vcmp.lt.f32.partialorder %v642_v56, 1.0 }
 0x141   : > { %v1296_v1 = vpop.xlane.xlu1 %571 }
 0x145   : > { %v1298_v23 = vpop.xlane.xlu0 %568 }
 0x149   : > { %v1316_v32 = vpop.xlane.xlu1 %577  ;;  %v1318_v34 = vpop.xlane.xlu0 %574 }
 0x14d   : > { %v1322_v39 = vpop.xlane.xlu0 %580 }
 0x151   : > { %v1320_v35 = vpop.xlane.xlu1 %583 }
 0x155   : > { %v1324_v40 = vpop.xlane.xlu1 %586 }
 0x159   : > { %v479_v57 = vpop.xlane.xlu1 %478  ;;  %v1334_v50 = vpop.xlane.xlu0 %589 }
 0x15a   : > { %1006 = vlog2.f32 %v479_v57  ;;  %v360_v57 = vld [vmem:[%s1304_s28 + $0x38] sm:$0xff] }
 0x15b   : > { %v639_v14 = vsub.f32 %v360_v57, %v368_v19 }
 0x15d   : > { %v488_v2 = vpop.xlane.xlu1 %487  ;;  %v482_v8 = vpop.xlane.xlu0 %481  ;;  %v647_v55 = vand.u32 2147483647, %v639_v14  ;;  %v663_v57 = vmul.f32 0.5, %v639_v14 }
 0x15e   : > { %1008 = vlog2.f32 %v488_v2 }
 0x15f   : > { %1010 = vlog2.f32 %v482_v8 }
 0x161   : > { %v494_v27 = vpop.xlane.xlu1 %493  ;;  %v485_v33 = vpop.xlane.xlu0 %484 }
 0x162   : > { %1012 = vlog2.f32 %v494_v27  ;;  %v666_v27 = vmul.f32 %v658_v62, %v634_v24 }
 0x163   : > { %1014 = vlog2.f32 %v485_v33  ;;  %v944_v33 = vadd.f32 -0.5, %v642_v56 }
 0x164   : > { %v1007_v53 = vpop.eup %1006 }
 0x165   : > { %v502_v58 = vmul.f32 0.6931472, %v1007_v53  ;;  %v500_v59 = vpop.xlane.xlu1 %499  ;;  %v491_v60 = vpop.xlane.xlu0 %490 }
 0x166   : > { %1016 = vlog2.f32 %v500_v59 }
 0x167   : > { %v517_v2 = vadd.f32 %v502_v58, %v1207_v43  ;;  %1018 = vlog2.f32 %v491_v60 }
 0x168   : > { %v1009_v15 = vpop.eup %1008 }
 0x169   : > { %v1011_v43 = vpop.eup %1010  ;;  %v508_v0 = vmul.f32 0.6931472, %v1009_v15  ;;  %v707_v41 = vpop.permute.xlu1 %706  ;;  %v591_v37 = vsub.f32 %v517_v2, %v1298_v23  ;;  %v683_v23 = vsel %vm1358_vm10, %v667_v54, %v945_v20  ;;  %v682_v54 = vsel %vm1380_vm14, %v666_v27, %v944_v33 }
 0x16a   : > { %v497_v21 = vpop.xlane.xlu0 %496  ;;  %v504_v22 = vmul.f32 0.6931472, %v1011_v43  ;;  %vm723_vm4 = vcmp.eq.s32.totalorder %v707_v41, 1  ;;  %vm403_vm10 = vcmp.gt.s32.totalorder %v1182_v31, 4294967295 }
 0x16b   : > { %1020 = vlog2.f32 %v497_v21  ;;  %v520_v52 = vadd.f32 %v508_v0, %v1209_v44  ;;  %v685_v44 = vsel %vm1368_vm12, %v1363_v63, %v1365_v5  ;;  %v599_v20 = vsel %vm396_vm8, %v591_v37, 0.0 }
 0x16c   : > { %v1013_v19 = vpop.eup %1012  ;;  %v518_v24 = vadd.f32 %v504_v22, %v1211_v45  ;;  %v686_v45 = vsel %vm1372_vm13, %v1376_v3, %v1378_v16  ;;  %v731_v4 = vsel %vm723_vm4, %v683_v23, 0.0  ;;  %v671_v63 = vmul.f32 %v663_v57, %v639_v14 }
 0x16d   : > { %v1015_v11 = vpop.eup %1014  ;;  %v594_v56 = vsub.f32 %v520_v52, %v1316_v32  ;;  %v512_v58 = vmul.f32 0.6931472, %v1013_v19  ;;  %v713_v59 = vpop.permute.xlu1 %712  ;;  %v684_v32 = vsel %vm1391_vm1, %v1385_v36, %v1388_v38  ;;  %v949_v5 = vadd.f32 -0.5, %v647_v55 }
 0x16e   : > { %v592_v60 = vsub.f32 %v518_v24, %v1296_v1  ;;  %v506_v61 = vmul.f32 0.6931472, %v1015_v11  ;;  %vm725_vm8 = vcmp.eq.s32.totalorder %v713_v59, 1  ;;  %vm1424_vm12 = vcmp.lt.f32.partialorder %v647_v55, 1.0 }
 0x16f   : > { %v522_v62 = vadd.f32 %v512_v58, %v1213_v46  ;;  %v608_v46 = vsel %vm607_vm2, %v599_v20, 0.0  ;;  %v602_v14 = vsel %vm399_vm11, %v594_v56, 0.0  ;;  %v733_v21 = vsel %vm725_vm8, %v685_v44, 0.0 }
 0x170   : > { %v1017_v7 = vpop.eup %1016  ;;  %v600_v9 = vsel %vm397_vm9, %v592_v60, 0.0  ;;  %v519_v1 = vadd.f32 %v506_v61, %v1205_v42  ;;  %v742_v42 = vsel %vm736_vm7, %v731_v4, 0.0  ;;  %v613_v26 = vsel %vm607_vm2, %v602_v14, 0.0 }
 0x171   : > { %v1019_v8 = vpop.eup %1018  ;;  %v609_v15 = vsel %vm607_vm2, %v600_v9, 0.0  ;;  %v516_v6 = vmul.f32 0.6931472, %v1017_v7  ;;  %v704_v3 = vpop.permute.xlu0 %703  ;;  %v596_v0 = vsub.f32 %v522_v62, %v1320_v35  ;;  %v746_v58 = vsel %vm736_vm7, %v733_v21, 0.0 }
 0x172   : > { %v610_v16 = vadd.f32 %v609_v15, %v608_v46  ;;  %v593_v12 = vsub.f32 %v519_v1, %v1318_v34  ;;  %v510_v17 = vmul.f32 0.6931472, %v1019_v8  ;;  %v716_v43 = vpop.permute.xlu1 %715  ;;  %vm722_vm9 = vcmp.eq.s32.totalorder %v704_v3, 1 }
 0x173   : > { %v524_v41 = vadd.f32 %v516_v6, %v1217_v49  ;;  %v730_v37 = vsel %vm722_vm9, %v682_v54, 0.0  ;;  %vm726_vm11 = vcmp.eq.s32.totalorder %v716_v43, 1  ;;  %v783_v7 = vadd.f32 %v782_v30, %v1294_v18 }
 0x174   : > { %v601_v33 = vsel %vm398_vm15, %v593_v12, 0.0  ;;  %v521_v36 = vadd.f32 %v510_v17, %v1215_v47  ;;  %v740_v38 = vsel %vm736_vm7, %v730_v37, 0.0  ;;  %v604_v47 = vsel %vm401_vm3, %v596_v0, 0.0 }
 0x175   : > { %v1021_v27 = vpop.eup %1020  ;;  %v611_v34 = vsel %vm607_vm2, %v601_v33, 0.0  ;;  %v710_v35 = vpop.permute.xlu0 %709  ;;  %v741_v53 = vadd.f32 %v740_v38, %v1353_v10  ;;  %v598_v57 = vsub.f32 %v524_v41, %v1334_v50  ;;  %v687_v10 = vsel %vm1424_vm12, %v671_v63, %v949_v5 }
 0x176   : > { %v514_v22 = vmul.f32 0.6931472, %v1021_v27  ;;  %v612_v52 = vadd.f32 %v611_v34, %v610_v16  ;;  %v595_v49 = vsub.f32 %v521_v36, %v1322_v39  ;;  %vm724_vm13 = vcmp.eq.s32.totalorder %v710_v35, 1 }
 0x177   : > { %v732_v25 = vsel %vm724_vm13, %v684_v32, 0.0  ;;  %v743_v24 = vadd.f32 %v742_v42, %v741_v53  ;;  %v734_v50 = vsel %vm726_vm11, %v686_v45, 0.0  ;;  %v606_v59 = vsel %vm403_vm10, %v598_v57, 0.0 }
 0x178   : > { %v523_v55 = vadd.f32 %v514_v22, %v1222_v51  ;;  %v603_v19 = vsel %vm400_vm5, %v595_v49, 0.0  ;;  %v744_v23 = vsel %vm736_vm7, %v732_v25, 0.0  ;;  %v614_v44 = vadd.f32 %v613_v26, %v612_v52 }
 0x179   : > { %v719_v11 = vpop.permute.xlu0 %718  ;;  %v615_v51 = vsel %vm607_vm2, %v603_v19, 0.0  ;;  %v745_v28 = vadd.f32 %v744_v23, %v743_v24  ;;  %v617_v54 = vsel %vm607_vm2, %v604_v47, 0.0  ;;  %v748_v45 = vsel %vm736_vm7, %v734_v50, 0.0 }
 0x17a   : > { %v597_v39 = vsub.f32 %v523_v55, %v1324_v40  ;;  %vm727_vm14 = vcmp.eq.s32.totalorder %v719_v11, 1  ;;  %v616_v56 = vadd.f32 %v615_v51, %v614_v44  ;;  %v621_v4 = vsel %vm607_vm2, %v606_v59, 0.0 }
 0x17b   : > { %v735_v20 = vsel %vm727_vm14, %v687_v10, 0.0  ;;  %v747_v13 = vadd.f32 %v746_v58, %v745_v28  ;;  %v371_v36 = vshrl.u32 %v370_v48, 7 }
 0x17c   : > { %v605_v40 = vsel %vm402_vm6, %v597_v39, 0.0  ;;  %v618_v60 = vadd.f32 %v617_v54, %v616_v56  ;;  %v750_v63 = vsel %vm736_vm7, %v735_v20, 0.0 }
 0x17d   : > { %v619_v61 = vsel %vm607_vm2, %v605_v40, 0.0  ;;  %v749_v62 = vadd.f32 %v748_v45, %v747_v13  ;;  %vm795_vm2 = vcmp.eq.s32.totalorder %v371_v36, 2  ;;  %vm794_vm0 = vcmp.eq.s32.totalorder %v371_v36, 1 }
 0x17e   : > { %v620_v32 = vadd.f32 %v619_v61, %v618_v60  ;;  %vm793_vm7 = vcmp.eq.s32.totalorder %v371_v36, 0 }
 0x17f   : > { %v751_v31 = vadd.f32 %v750_v63, %v749_v62 }
 0x180   : > { %v622_v5 = vadd.f32 %v621_v4, %v620_v32 }
 0x181   : > { %752 = vadd.xlane.f32.xlu0 %v751_v31 }
 0x182   : > { %623 = vadd.xlane.f32.xlu1 %v622_v5 }
 0x185   : > { %784 = vadd.xlane.f32.xlu0 %v783_v7 }
 0x20e   : > { %v753_v1 = vpop.xlane.xlu0 %752 }
 0x20f   : > { %v624_v9 = vpop.xlane.xlu1 %623  ;;  %v754_v8 = vrot.slane %v753_v1, 4 }
 0x210   : > { %v625_v2 = vrot.slane %v624_v9, 4 }
 0x211   : > { %v755_v14 = vadd.f32 %v754_v8, %v753_v1 }
 0x212   : > { %v626_v46 = vadd.f32 %v625_v2, %v624_v9  ;;  %v785_v15 = vpop.xlane.xlu0 %784 }
 0x213   : > { %v756_v3 = vrot.slane %v755_v14, 2  ;;  %v786_v16 = vrot.slane %v785_v15, 4 }
 0x214   : > { %v627_v6 = vrot.slane %v626_v46, 2 }
 0x215   : > { %v787_v12 = vadd.f32 %v786_v16, %v785_v15  ;;  %v757_v42 = vadd.f32 %v756_v3, %v755_v14 }
 0x216   : > { %v628_v17 = vadd.f32 %v627_v6, %v626_v46 }
 0x217   : > { %v788_v43 = vrot.slane %v787_v12, 2  ;;  %v758_v41 = vrot.slane %v757_v42, 1 }
 0x218   : > { %v629_v0 = vrot.slane %v628_v17, 1 }
 0x219   : > { %v789_v21 = vadd.f32 %v788_v43, %v787_v12  ;;  %v759_v27 = vadd.f32 %v758_v41, %v757_v42 }
 0x21a   : > { %v630_v18 = vadd.f32 %v629_v0, %v628_v17 }
 0x21b   : > { %v790_v26 = vrot.slane %v789_v21, 1 }
 0x21c   : > { %956 = vpush %v630_v18 }
 0x21d   : > { %958 = vpush %v759_v27  ;;  %v791_v33 = vadd.f32 %v790_v26, %v789_v21 }
 0x21f   : > { %960 = vpush %v791_v33 }
 0x24d   : > { %s957_s6 = spop %956 }
 0x24e   : > { %s959_s7 = spop %958  ;;  %v800_v38 = vstv %s957_s6 }
 0x24f   : > { %v798_v34 = vstv %s959_s7 }
 0x250   : > { %s961_s9 = spop %960 }
 0x251   : > { %v796_v37 = vstv %s961_s9 }
 0x252   : > { %v797_v22 = vsel %vm795_vm2, %v796_v37, 0.0 }
 0x253   : > { %v799_v35 = vsel %vm794_vm0, %v798_v34, %v797_v22 }
 0x254   : > { %v801_v52 = vsel %vm793_vm7, %v800_v38, %v799_v35 }
 0x255   : > { %802 = vst [vmem:[%s335_s12] sm:$0xff] %v801_v52 }
 0x256 PF: > { %s14_s17 = sadd.s32 1, %s1044_s17   ;;  %s1506_s15 = smov %s1040_s16 }
 0x257   : > { %p11_p5 = scmp.ge.s32.totalorder %s14_s17, 4   ;;  %s1507_s16 = smov %s1509_s18 }
 0x259   :  { %13 = sbr.rel (!%p11_p5) target bundleno = 2 (0x2), region = 75 }

</bundles_post_ra>
